<compile_context>
chip_gen: v5e
topology: v5e:2x2
jax: 0.10.0
libtpu: 0.0.40
codegen_flags: <defaults>
</compile_context>

<pallas_src>
import jax
import jax.numpy as jnp
from jax import lax
from jax.experimental import pallas as pl
from jax.experimental.pallas import tpu as pltpu

_VMEM_LIMIT = 48 * 1024 * 1024   # > 16/32 MiB defaults, < v7x's 64 MiB physical


def _round_up(n, m):
    return ((n + m - 1) // m) * m


# ----------------------- generic tiled matmul + bias kernel -----------------------

def _matmul_bias_kernel(x_ref, w_ref, b_ref, o_ref):
    # x_ref: (tn, K) bf16 ; w_ref: (K, tv) bf16 ; b_ref: (1, tv) f32 ; o_ref: (tn, tv) f32
    o_ref[...] = (
        jnp.dot(x_ref[...], w_ref[...], preferred_element_type=jnp.float32)
        + b_ref[...]
    )


def linear_forward(x, w, b, *, tn_max=128, tv_max=1024):
    """y = x @ w + b with a lane-dense (tn, tv) output grid (bf16 MXU operands)."""
    N, K = x.shape
    V = w.shape[1]
    tn = min(tn_max, _round_up(N, 8))       # sublane-aligned row tile
    tv = min(tv_max, _round_up(V, 128))     # lane-dense column tile
    n_pad = _round_up(N, tn)
    v_pad = _round_up(V, tv)

    xp = x.astype(jnp.bfloat16)
    if n_pad != N:
        xp = jnp.pad(xp, ((0, n_pad - N), (0, 0)))
    wp = w.astype(jnp.bfloat16)             # no-op when params were pre-cast
    bp = b.astype(jnp.float32).reshape(1, V)
    if v_pad != V:
        wp = jnp.pad(wp, ((0, 0), (0, v_pad - V)))
        bp = jnp.pad(bp, ((0, 0), (0, v_pad - V)))

    out = pl.pallas_call(
        _matmul_bias_kernel,
        out_shape=jax.ShapeDtypeStruct((n_pad, v_pad), jnp.float32),
        grid_spec=pltpu.PrefetchScalarGridSpec(
            num_scalar_prefetch=0,
            grid=(n_pad // tn, v_pad // tv),
            in_specs=[
                pl.BlockSpec((tn, K), lambda i, j: (i, 0)),
                pl.BlockSpec((K, tv), lambda i, j: (0, j)),
                pl.BlockSpec((1, tv), lambda i, j: (0, j)),
            ],
            out_specs=pl.BlockSpec((tn, tv), lambda i, j: (i, j)),
        ),
        compiler_params=pltpu.CompilerParams(
            dimension_semantics=("parallel", "parallel"),
            vmem_limit_bytes=_VMEM_LIMIT),
    )(xp, wp, bp)
    return out[:N, :V]


# --------------------------- fused multi-layer LSTM kernel -------------------------

def _make_lstm_stack_kernel(num_layers, seq_len, bt, hidden, gx_chunk):
    H = hidden
    n_chunks = (seq_len + gx_chunk - 1) // gx_chunk

    def kernel(*refs):
        len_ref, x_ref = refs[0], refs[1]
        w_refs = refs[2:2 + 3 * num_layers]
        out_ref = refs[2 + 3 * num_layers]          # (seq, bt, H) bf16
        gx_ref = refs[3 + 3 * num_layers]           # (gx_chunk*bt, 4H) f32 scratch
        act_ref = refs[4 + 3 * num_layers]          # (seq*bt, H)  bf16 scratch

        lens = len_ref[...]                         # (bt, 1) int32

        for layer in range(num_layers):
            wih_ref = w_refs[3 * layer]             # (in_dim, 4H) bf16
            whh_ref = w_refs[3 * layer + 1]         # (H, 4H)      bf16
            bias_ref = w_refs[3 * layer + 2]        # (1, 4H)      f32
            last = layer == num_layers - 1

            h = jnp.zeros((bt, H), jnp.float32)
            c = jnp.zeros((bt, H), jnp.float32)

            for chunk in range(n_chunks):           # static python loop
                t0 = chunk * gx_chunk
                csz = min(gx_chunk, seq_len - t0)

                # Hoisted input projection for this time chunk: one big MXU
                # matmul covering csz timesteps (bounded gx scratch for v7x).
                if layer == 0:
                    xin = x_ref[pl.ds(t0, csz), :, :].reshape(
                        csz * bt, x_ref.shape[-1])
                else:
                    xin = act_ref[pl.ds(t0 * bt, csz * bt), :]
                gx_ref[pl.ds(0, csz * bt), :] = (
                    jnp.dot(xin.astype(jnp.bfloat16), wih_ref[...],
                            preferred_element_type=jnp.float32)
                    + bias_ref[...])

                def step(tl, carry, _t0=t0, _last=last, _whh_ref=whh_ref):
                    h, c = carry
                    t = _t0 + tl
                    row = pl.multiple_of(tl * bt, bt)
                    # W_hh is re-read from its VMEM ref every step so its value
                    # is not held live across the unrolled time loop (avoids
                    # vreg spills on the latency-critical recurrence).
                    gates = gx_ref[pl.ds(row, bt), :] + jnp.dot(
                        h.astype(jnp.bfloat16), _whh_ref[...],
                        preferred_element_type=jnp.float32)          # (bt, 4H) f32
                    # Gate columns were permuted at param-prep time to [i,f,o,g]:
                    # one sigmoid over 3H lanes, one tanh over H lanes.
                    ifo = jax.nn.sigmoid(gates[:, :3 * H])
                    g_g = jnp.tanh(gates[:, 3 * H:])
                    c_new = ifo[:, H:2 * H] * c + ifo[:, :H] * g_g
                    h_new = ifo[:, 2 * H:3 * H] * jnp.tanh(c_new)
                    if _last:
                        # pack/pad_packed semantics: outputs at t >= length are 0.
                        mask = (t < lens).astype(jnp.float32)        # (bt, 1)
                        out_ref[t] = (h_new * mask).astype(out_ref.dtype)
                    else:
                        orow = pl.multiple_of(t * bt, bt)
                        act_ref[pl.ds(orow, bt), :] = h_new.astype(act_ref.dtype)
                    return h_new, c_new

                h, c = lax.fori_loop(0, csz, step, (h, c), unroll=True)

    return kernel


def lstm_stack_forward(x_tm, lengths_col, lstm_params, *, batch_tile, gx_chunk=32):
    # x_tm: (seq, bp, E) f32 time-major ; lengths_col: (bp, 1) int32
    seq_len, bp, embed = x_tm.shape
    hidden = lstm_params[0]["whh"].shape[0]
    num_layers = len(lstm_params)
    assert bp % batch_tile == 0
    gx_chunk = min(gx_chunk, seq_len)

    in_specs = [
        pl.BlockSpec((batch_tile, 1), lambda i: (i, 0)),                  # lengths
        pl.BlockSpec((seq_len, batch_tile, embed), lambda i: (0, i, 0)),  # x
    ]
    args = [lengths_col, x_tm]
    for p in lstm_params:
        for name in ("wih", "whh", "b"):                  # pre-cast at param prep
            arr = p[name]
            in_specs.append(pl.BlockSpec(arr.shape, lambda i: (0, 0)))
            args.append(arr)

    kernel = _make_lstm_stack_kernel(num_layers, seq_len, batch_tile, hidden,
                                     gx_chunk)
    return pl.pallas_call(
        kernel,
        out_shape=jax.ShapeDtypeStruct((seq_len, bp, hidden), jnp.bfloat16),
        grid_spec=pltpu.PrefetchScalarGridSpec(
            num_scalar_prefetch=0,
            grid=(bp // batch_tile,),                     # batch tiles -> megacore
            in_specs=in_specs,
            out_specs=pl.BlockSpec((seq_len, batch_tile, hidden),
                                   lambda i: (0, i, 0)),
            scratch_shapes=[
                pltpu.VMEM((gx_chunk * batch_tile, 4 * hidden), jnp.float32),
                pltpu.VMEM((seq_len * batch_tile, hidden), jnp.bfloat16),
            ],
        ),
        compiler_params=pltpu.CompilerParams(
            dimension_semantics=("parallel",),
            vmem_limit_bytes=_VMEM_LIMIT),
    )(*args)


# ------------------- vocab projection with batch-major output --------------------

def _vocab_proj_kernel(h_ref, w_ref, b_ref, o_ref):
    # h_ref: (seq, bt, H) bf16 time-major ; w_ref: (H, tv) bf16 ; b_ref: (1, tv) f32
    # o_ref: (bt, seq, tv) f32 batch-major tile
    seq, bt, H = h_ref.shape
    tv = o_ref.shape[-1]
    y = (jnp.dot(h_ref[...].reshape(seq * bt, H), w_ref[...],
                 preferred_element_type=jnp.float32)
         + b_ref[...])
    # time-major -> batch-major reorder happens inside VMEM; the output
    # BlockSpec index_map places the tile at its batch-major HBM position,
    # so no separate XLA transpose pass over the hidden/logits tensors.
    o_ref[...] = jnp.swapaxes(y.reshape(seq, bt, tv), 0, 1)


def vocab_projection_forward(hidden_tm, w, b, *, batch_tile, tv_max=512):
    seq, bp, H = hidden_tm.shape
    V = w.shape[1]
    tv = min(tv_max, _round_up(V, 128))
    v_pad = _round_up(V, tv)

    wp = w.astype(jnp.bfloat16)             # no-op when params were pre-cast
    bpad = b.astype(jnp.float32).reshape(1, V)
    if v_pad != V:
        wp = jnp.pad(wp, ((0, 0), (0, v_pad - V)))
        bpad = jnp.pad(bpad, ((0, 0), (0, v_pad - V)))

    return pl.pallas_call(
        _vocab_proj_kernel,
        out_shape=jax.ShapeDtypeStruct((bp, seq, v_pad), jnp.float32),
        grid_spec=pltpu.PrefetchScalarGridSpec(
            num_scalar_prefetch=0,
            grid=(bp // batch_tile, v_pad // tv),
            in_specs=[
                pl.BlockSpec((seq, batch_tile, H), lambda i, j: (0, i, 0)),
                pl.BlockSpec((H, tv), lambda i, j: (0, j)),
                pl.BlockSpec((1, tv), lambda i, j: (0, j)),
            ],
            out_specs=pl.BlockSpec((batch_tile, seq, tv), lambda i, j: (i, 0, j)),
        ),
        compiler_params=pltpu.CompilerParams(
            dimension_semantics=("parallel", "parallel"),
            vmem_limit_bytes=_VMEM_LIMIT),
    )(hidden_tm, wp, bpad)


# ----------------------------------- forward ---------------------------------------

def net_forward(params, image, caption, lengths, *, batch_tile=None):
    B, C, Hs, Ws = image.shape
    HW = Hs * Ws
    V = params["lin_w"].shape[1]

    # Encoder: global average pool (tiny XLA reduce) + fc matmul (Pallas, K=C).
    # TODO(synk): pretrained ResNet-50 backbone not reproduced; replaced by a
    # global average pool over spatial dims feeding the module's trainable fc.
    pooled = jnp.mean(image.reshape(B, C, HW), axis=-1)                  # (B, C)
    feature = linear_forward(pooled, params["fc_w"], params["fc_b"])     # (B, E)

    # Decoder input, built time-major directly (no activation transpose).
    # TODO(synk): embedding lookup stays an XLA gather (no dedicated Pallas kernel).
    emb = jnp.take(params["embedding"], caption.T, axis=0)               # (T, B, E)
    x_tm = jnp.concatenate([feature[None, :, :], emb], axis=0)           # (T+1, B, E)

    # Batch tile: as large as possible (MXU fill on the serial recurrence),
    # but keep >=2 grid tiles when the batch allows it (megacore on v7x).
    if batch_tile is None:
        bt = min(128, _round_up(B, 16))
        if bt > 16 and _round_up(B, bt) // bt < 2:
            bt = max(16, _round_up(bt // 2, 16))
        batch_tile = bt
    bp = _round_up(B, batch_tile)
    if bp != B:
        x_tm = jnp.pad(x_tm, ((0, 0), (0, bp - B), (0, 0)))
    lengths_arr = jnp.asarray(lengths, jnp.int32)
    lengths_col = jnp.pad(lengths_arr, (0, bp - B)).reshape(bp, 1)

    # Fused multi-layer LSTM; length masking done in-kernel; bf16 hidden out.
    hidden = lstm_stack_forward(x_tm, lengths_col, params["lstm"],
                                batch_tile=batch_tile)          # (T+1, bp, H) bf16

    # Vocab projection: reads time-major hidden, writes batch-major logits.
    logits_full = vocab_projection_forward(hidden, params["lin_w"],
                                           params["lin_b"],
                                           batch_tile=batch_tile)  # (bp, T+1, Vp)

    t_out = int(max(lengths))
    logits = logits_full[:B, :t_out, :V].reshape(B * t_out, V)
    return logits


# ----------------------------------- param prep -------------------------------------

def init_params(key, vocab_size, embed_dim, hidden_dim, num_layers, in_channels):
    """Raw (PyTorch-layout, f32, [i,f,g,o] gate order) parameters."""
    keys = jax.random.split(key, 5 + 4 * num_layers)
    s = 0.1
    params = {
        # stands in for TEXT.vocab.vectors (frozen embedding table)
        "embedding": s * jax.random.normal(keys[0], (vocab_size, embed_dim), jnp.float32),
        # Encoder.body.fc
        "fc_w": s * jax.random.normal(keys[1], (in_channels, embed_dim), jnp.float32),
        "fc_b": s * jax.random.normal(keys[2], (1, embed_dim), jnp.float32),
        # Decoder.linear
        "lin_w": s * jax.random.normal(keys[3], (hidden_dim, vocab_size), jnp.float32),
        "lin_b": s * jax.random.normal(keys[4], (1, vocab_size), jnp.float32),
    }
    lstm = []
    for layer in range(num_layers):
        in_dim = embed_dim if layer == 0 else hidden_dim
        k0, k1, k2, k3 = keys[5 + 4 * layer: 9 + 4 * layer]
        lstm.append({
            "wih": s * jax.random.normal(k0, (in_dim, 4 * hidden_dim), jnp.float32),
            "whh": s * jax.random.normal(k1, (hidden_dim, 4 * hidden_dim), jnp.float32),
            "b": s * (jax.random.normal(k2, (1, 4 * hidden_dim), jnp.float32)
                      + jax.random.normal(k3, (1, 4 * hidden_dim), jnp.float32)),
        })
    params["lstm"] = lstm
    return params


def prepare_params(params):
    """One-time conversion to kernel dtypes + gate-order permutation [i,f,g,o]->[i,f,o,g]."""
    H = params["lstm"][0]["whh"].shape[0]

    def permute_gates(a):
        i, f, g, o = (a[..., k * H:(k + 1) * H] for k in range(4))
        return jnp.concatenate([i, f, o, g], axis=-1)

    return {
        "embedding": params["embedding"].astype(jnp.float32),
        "fc_w": params["fc_w"].astype(jnp.bfloat16),
        "fc_b": params["fc_b"].astype(jnp.float32).reshape(1, -1),
        "lin_w": params["lin_w"].astype(jnp.bfloat16),
        "lin_b": params["lin_b"].astype(jnp.float32).reshape(1, -1),
        "lstm": [
            {"wih": permute_gates(p["wih"]).astype(jnp.bfloat16),
             "whh": permute_gates(p["whh"]).astype(jnp.bfloat16),
             "b": permute_gates(p["b"]).astype(jnp.float32).reshape(1, -1)}
            for p in params["lstm"]
        ],
    }


# -------------------------------------- main ----------------------------------------

if __name__ == "__main__":
    key = jax.random.PRNGKey(0)
    # Small but lane/sublane-friendly sizes (E, H, V multiples of 128).
    B, C, Himg, Wimg = 2, 4, 16, 16
    vocab_size, embed_dim, hidden_dim, num_layers = 256, 128, 128, 2
    Tcap = 7
    lengths = [8, 6]   # sorted descending, <= Tcap+1 (pack_padded_sequence convention)

    k_img, k_cap, k_par = jax.random.split(key, 3)
    image = jax.random.normal(k_img, (B, C, Himg, Wimg), jnp.float32)
    caption = jax.random.randint(k_cap, (B, Tcap), 0, vocab_size)
    raw_params = init_params(k_par, vocab_size, embed_dim, hidden_dim, num_layers, C)
    params = prepare_params(raw_params)   # one-time dtype cast + gate permutation

    out = net_forward(params, image, caption, lengths)
    out = jax.block_until_ready(out)
    assert out.shape == (B * max(lengths), vocab_size), out.shape
    assert bool(jnp.all(jnp.isfinite(out)))
    print("KERNEL_OK")
</pallas_src>

<mosaic_0001>
module attributes {stable_mosaic.version = 11 : i64} {
  func.func @_matmul_bias_kernel(%arg0: i32, %arg1: i32, %arg2: memref<8x4xbf16, #tpu.memory_space<vmem>>, %arg3: memref<4x128xbf16, #tpu.memory_space<vmem>>, %arg4: memref<1x128xf32, #tpu.memory_space<vmem>>, %arg5: memref<8x128xf32, #tpu.memory_space<vmem>>) attributes {dimension_semantics = [#tpu.dimension_semantics<parallel>, #tpu.dimension_semantics<parallel>], iteration_bounds = array<i64: 1, 1>, scalar_prefetch = 0 : i64, scratch_operands = 0 : i64, tpu.core_type = #tpu.core_type<tc>, window_params = [{transform_indices = @transform_0, window_bounds = array<i64: 8, 4>}, {transform_indices = @transform_1, window_bounds = array<i64: 4, 128>}, {transform_indices = @transform_2, window_bounds = array<i64: 1, 128>}, {transform_indices = @transform_3, window_bounds = array<i64: 8, 128>}]} {
    %c0 = arith.constant 0 : index
    %c0_0 = arith.constant 0 : index
    %0 = vector.load %arg2[%c0, %c0_0] : memref<8x4xbf16, #tpu.memory_space<vmem>>, vector<8x4xbf16>
    %c0_1 = arith.constant 0 : index
    %c0_2 = arith.constant 0 : index
    %1 = vector.load %arg3[%c0_1, %c0_2] : memref<4x128xbf16, #tpu.memory_space<vmem>>, vector<4x128xbf16>
    %cst = arith.constant dense<0.000000e+00> : vector<8x128xf32>
    %2 = tpu.matmul %0, %1, %cst {dimension_numbers = #tpu.dot_dimension_numbers<[1], [0], [0], [1], [0, 0, 1, 1], [], []>} : vector<8x4xbf16>, vector<4x128xbf16>, vector<8x128xf32> -> vector<8x128xf32>
    %c0_3 = arith.constant 0 : index
    %c0_4 = arith.constant 0 : index
    %3 = vector.load %arg4[%c0_3, %c0_4] : memref<1x128xf32, #tpu.memory_space<vmem>>, vector<1x128xf32>
    %4 = vector.broadcast %3 : vector<1x128xf32> to vector<8x128xf32>
    %5 = arith.addf %2, %4 : vector<8x128xf32>
    %c0_5 = arith.constant 0 : index
    %c0_6 = arith.constant 0 : index
    %6 = vector.load %arg5[%c0_5, %c0_6] : memref<8x128xf32, #tpu.memory_space<vmem>>, vector<8x128xf32>
    tpu.vector_store %arg5[%c0_5, %c0_6], %5 {strides = array<i32>} : memref<8x128xf32, #tpu.memory_space<vmem>>, vector<8x128xf32>,
    return
  }
  func.func @transform_0(%arg0: i32, %arg1: i32) -> (i32, i32) {
    %c0_i32 = arith.constant 0 : i32
    %c0_i32_0 = arith.constant 0 : i32
    return %arg0, %c0_i32 : i32, i32
  }
  func.func @transform_1(%arg0: i32, %arg1: i32) -> (i32, i32) {
    %c0_i32 = arith.constant 0 : i32
    %c0_i32_0 = arith.constant 0 : i32
    return %c0_i32, %arg1 : i32, i32
  }
  func.func @transform_2(%arg0: i32, %arg1: i32) -> (i32, i32) {
    %c0_i32 = arith.constant 0 : i32
    %c0_i32_0 = arith.constant 0 : i32
    return %c0_i32, %arg1 : i32, i32
  }
  func.func @transform_3(%arg0: i32, %arg1: i32) -> (i32, i32) {
    %c0_i32 = arith.constant 0 : i32
    return %arg0, %arg1 : i32, i32
  }
}

</mosaic_0001>

<bundles_post_ra>
// kernel: tpu_custom_call.1
= control target key start
LH: loop header
LB: loop body
LE: loop exit
PB: predicated region body
PF: predicated region fallthrough
CT: control target
= control target key end

     0   :  { %vm26_vm0 = vcmask 1041408   ;;  %vm22_vm1 = vcmask 31744   ;;  %s122_s0 = inlined_call_operand.vmem [shape: bf16[8,4], index: 0, kind: input, shape index: {}]   ;;  %s123_s1 = inlined_call_operand.vmem [shape: bf16[4,128], index: 1, kind: input, shape index: {}]   ;;  %s124_s2 = inlined_call_operand.vmem [shape: f32[1,128], index: 2, kind: input, shape index: {}]   ;;  %s125_s3 = inlined_call_operand.hbm [shape: f32[8,128], index: 3, kind: output, shape index: {}]  }
   0x1   :  { %v17_v0 = vld [vmem:[%s123_s1] sm:$0x3] }
   0x2   :  { %v28_v1 = vsel %vm26_vm0, %v17_v0, 0  ;;  %v16_v2 = vld [vmem:[%s122_s0] sm:$0xf] }
   0x3   :  { %37 = vmatpush.bf16.msra.mxu0 %v28_v1 }
   0x4   :  { %8 = vsyncpa [#allocation3], 0  ;;  %v62_v3 = vld [vmem:[%s124_s2] ss:$0 sm:$0xff]  ;;  %s89_s18 = smov [#allocation2]   ;;  %s51_s1 = sshll.u32 %s125_s3, 4  ;;  %s52_s1 = int_to_ptr.hbm [resolvable:$true] %s51_s1 }
   0x5   :  { %s49_s19 = sshll.u32 %s89_s18, 4  ;;  %s50_s19 = int_to_ptr.vmem [resolvable:$true] %s49_s19 }
   0x6   :  { %60 = vmatmul.msk.bf16.vlgmr.msra.gmra.mxu0 %vm22_vm1, %v16_v2 }
  0x83   :  { %v39_v4 = vpop.f32.mrf.mxu0 }
  0x84   :  { %v40_v5 = vadd.f32 %v62_v3, %v39_v4 }
  0x86   :  { %43 = vst [vmem:[#allocation2] sm:$0xff] %v40_v5 }
  0x87   :  { %54 = dma.vmem_to_hbm [thread:$0]  %s50_s19, 128, %s52_s1, [#allocation3]  }
  0x8b   :  { %v41_v6 = vpop.f32.mrf.mxu0 }
  0x8c   :  { %87 = dma.done.wait [#allocation3], 128  }
  0x8d   :  { %88 = vsyncadd [#allocation3], 4294967168 }
  0x8e   :  { %59 = vsyncpa [#allocation3], 1 }

</bundles_post_ra>
